<compile_context>
chip_gen: v7x
topology: tpu7x:2x2x1
jax: 0.10.0
libtpu: 0.0.40
codegen_flags: <defaults>
</compile_context>

<pallas_src>
import jax
import jax.numpy as jnp
from jax.experimental import pallas as pl
from jax.experimental.pallas import tpu as pltpu


# ----------------------------- kernel ----------------------------------------


def _attn_core(q, v):
    """q: (TQ, D), v: (S, D) in the input dtype. Returns f32 (ctx, attn)."""
    # score = q @ v^T, contracted over the hidden dim (no explicit transpose).
    # Operands stay in their native dtype (bf16-friendly MXU), accumulate f32.
    score = jax.lax.dot_general(
        q, v, (((1,), (1,)), ((), ())),
        preferred_element_type=jnp.float32)          # (TQ, S) f32

    # Numerically-stable row softmax (matches F.softmax over the last axis).
    m = jnp.max(score, axis=-1, keepdims=True)       # (TQ, 1)
    e = jnp.exp(score - m)                           # (TQ, S) f32, in (0, 1]
    denom = jnp.sum(e, axis=-1, keepdims=True)       # (TQ, 1)
    # Exact reciprocal of the narrow column (cheap) + broadcast multiply
    # instead of a full (TQ, S) divide.
    recip = 1.0 / denom                              # (TQ, 1)

    # context = (e @ v) * recip  -- MXU runs on unnormalized probabilities in
    # v's dtype; the normalization folds into a cheap broadcast multiply.
    ctx = jnp.dot(e.astype(v.dtype), v,
                  preferred_element_type=jnp.float32) * recip   # (TQ, D) f32
    attn = e * recip                                 # (TQ, S) f32
    return ctx, attn


def _attention_kernel(q_ref, v_ref, ctx_ref, attn_ref):
    # q_ref:    (1, TQ, D)   query row-tile for one batch element
    # v_ref:    (1, S,  D)   full value tensor for that batch element
    # ctx_ref:  (1, TQ, D)   context output tile
    # attn_ref: (1, TQ, S)   attention-weights output tile
    ctx, attn = _attn_core(q_ref[0], v_ref[0])
    ctx_ref[0] = ctx.astype(ctx_ref.dtype)
    attn_ref[0] = attn.astype(attn_ref.dtype)


def _attention_kernel_ctx_only(q_ref, v_ref, ctx_ref):
    ctx, _ = _attn_core(q_ref[0], v_ref[0])
    ctx_ref[0] = ctx.astype(ctx_ref.dtype)


# ----------------------------- wrapper ----------------------------------------


def _pick_tq(Lq, B):
    # Prefer 256 (fills v6e/v7x's 256-wide MXU M dim), else 128, else full Lq.
    tq = Lq
    for cand in (256, 128):
        if Lq % cand == 0:
            tq = cand
            break
    # Keep both v7x TensorCores fed: make sure the parallel grid has >= 2
    # points when possible (tq stays a multiple of 8 and a divisor of Lq).
    while B * (Lq // tq) < 2 and tq % 16 == 0:
        tq //= 2
    return tq


def dot_product_attention(query, value, *, tq=None, return_attn=True):
    """query: (B, Lq, D); value: (B, S, D).

    Returns (context (B, Lq, D), attn (B, Lq, S)) when return_attn=True,
    otherwise just context (drops the large (B, Lq, S) HBM write).
    """
    B, Lq, D = query.shape
    Bv, S, Dv = value.shape
    assert B == Bv and D == Dv, (query.shape, value.shape)

    if tq is None:
        tq = _pick_tq(Lq, B)
    assert Lq % tq == 0, (Lq, tq)
    grid = (B, Lq // tq)

    out_dtype = query.dtype
    itemsize = jnp.dtype(query.dtype).itemsize

    # ---- value BlockSpec: single-buffer it when the (S, D) block is big.
    # Its block index only changes with the batch axis, so the second buffer
    # buys almost nothing and is what blows v7x's 64 MiB VMEM at realistic S,D.
    v_block_bytes = S * D * itemsize
    single_buffer_v = v_block_bytes > (8 << 20)
    if single_buffer_v:
        v_spec = pl.BlockSpec((1, S, D), lambda b, i: (b, 0, 0),
                              pipeline_mode=pl.Buffered(1))
        v_bufs = 1
    else:
        v_spec = pl.BlockSpec((1, S, D), lambda b, i: (b, 0, 0))
        v_bufs = 2

    # ---- explicit VMEM budget: buffer sum + generous headroom.
    need = v_bufs * v_block_bytes                       # value block(s)
    need += 2 * tq * D * itemsize * 2                   # q in + ctx out (double-buffered)
    if return_attn:
        need += 2 * tq * S * itemsize                   # attn out (double-buffered)
    need += 4 * tq * S * 4 + 2 * tq * D * 4             # f32 score/e/attn + ctx intermediates
    vmem_limit = int(min(max(2 * need + (2 << 20), 32 << 20), 128 << 20))

    q_spec = pl.BlockSpec((1, tq, D), lambda b, i: (b, i, 0))
    ctx_spec = pl.BlockSpec((1, tq, D), lambda b, i: (b, i, 0))

    compiler_params = pltpu.CompilerParams(
        dimension_semantics=("parallel", "parallel"),
        vmem_limit_bytes=vmem_limit)

    if return_attn:
        out_shape = (
            jax.ShapeDtypeStruct((B, Lq, D), out_dtype),   # context
            jax.ShapeDtypeStruct((B, Lq, S), out_dtype),   # attn
        )
        out_specs = (
            ctx_spec,
            pl.BlockSpec((1, tq, S), lambda b, i: (b, i, 0)),
        )
        kernel = _attention_kernel
    else:
        out_shape = jax.ShapeDtypeStruct((B, Lq, D), out_dtype)
        out_specs = ctx_spec
        kernel = _attention_kernel_ctx_only

    return pl.pallas_call(
        kernel,
        out_shape=out_shape,
        grid_spec=pltpu.PrefetchScalarGridSpec(
            num_scalar_prefetch=0,
            grid=grid,
            in_specs=[q_spec, v_spec],
            out_specs=out_specs,
        ),
        compiler_params=compiler_params,
    )(query, value)


# ----------------------------- reference (plain JAX) ---------------------------


def _ref_attention(query, value):
    q = query.astype(jnp.float32)
    v = value.astype(jnp.float32)
    score = jnp.einsum("bqd,bsd->bqs", q, v)
    attn = jax.nn.softmax(score, axis=-1)
    ctx = jnp.einsum("bqs,bsd->bqd", attn, v)
    return ctx, attn


def _check(name, query, value, atol, rtol):
    ctx, attn = dot_product_attention(query, value)
    ctx_only = dot_product_attention(query, value, return_attn=False)
    ctx, attn, ctx_only = jax.block_until_ready((ctx, attn, ctx_only))

    B, Lq, D = query.shape
    S = value.shape[1]
    assert ctx.shape == (B, Lq, D), (name, ctx.shape)
    assert attn.shape == (B, Lq, S), (name, attn.shape)
    assert ctx_only.shape == (B, Lq, D), (name, ctx_only.shape)

    ctx_ref, attn_ref = _ref_attention(query, value)
    ctx_f = ctx.astype(jnp.float32)
    attn_f = attn.astype(jnp.float32)
    assert jnp.allclose(attn_f, attn_ref, atol=atol, rtol=rtol), (
        name, float(jnp.max(jnp.abs(attn_f - attn_ref))))
    assert jnp.allclose(ctx_f, ctx_ref, atol=atol, rtol=rtol), (
        name, float(jnp.max(jnp.abs(ctx_f - ctx_ref))))
    assert jnp.allclose(ctx_only.astype(jnp.float32), ctx_ref,
                        atol=atol, rtol=rtol), name
    # Sanity: attention rows sum to 1 (to output-dtype precision).
    assert jnp.allclose(attn_f.sum(-1), jnp.ones((B, Lq)),
                        atol=max(atol, 1e-5)), name


# ----------------------------- main --------------------------------------------

if __name__ == "__main__":
    key = jax.random.PRNGKey(0)
    k0, k1, k2, k3 = jax.random.split(key, 4)

    # 1) Small shapes implied by the forward: query (B, Lq, hidden),
    #    value (B, S, hidden).
    B, Lq, S, D = 2, 8, 16, 32
    query = jax.random.normal(k0, (B, Lq, D), jnp.float32)
    value = jax.random.normal(k1, (B, S, D), jnp.float32)
    _check("small_f32", query, value, atol=1e-5, rtol=1e-5)

    # 2) 128-aligned bf16 config: exercises the real (8,128) tiling, bf16 MXU
    #    operands, and unmasked lane-dense stores.
    B2, Lq2, S2, D2 = 2, 256, 256, 128
    query2 = jax.random.normal(k2, (B2, Lq2, D2), jnp.float32).astype(jnp.bfloat16)
    value2 = jax.random.normal(k3, (B2, S2, D2), jnp.float32).astype(jnp.bfloat16)
    _check("aligned_bf16", query2, value2, atol=5e-2, rtol=5e-2)

    print("KERNEL_OK")
</pallas_src>

<mosaic_0001>
module attributes {stable_mosaic.version = 11 : i64} {
  func.func @_attention_kernel(%arg0: i32, %arg1: i32, %arg2: memref<1x8x32xf32, #tpu.memory_space<vmem>>, %arg3: memref<1x16x32xf32, #tpu.memory_space<vmem>>, %arg4: memref<1x8x32xf32, #tpu.memory_space<vmem>>, %arg5: memref<1x8x16xf32, #tpu.memory_space<vmem>>) attributes {dimension_semantics = [#tpu.dimension_semantics<parallel>, #tpu.dimension_semantics<parallel>], iteration_bounds = array<i64: 2, 1>, scalar_prefetch = 0 : i64, scratch_operands = 0 : i64, tpu.core_type = #tpu.core_type<tc>, window_params = [{transform_indices = @transform_0, window_bounds = array<i64: 1, 8, 32>}, {transform_indices = @transform_1, window_bounds = array<i64: 1, 16, 32>}, {transform_indices = @transform_2, window_bounds = array<i64: 1, 8, 32>}, {transform_indices = @transform_3, window_bounds = array<i64: 1, 8, 16>}]} {
    %c0 = arith.constant 0 : index
    %c0_0 = arith.constant 0 : index
    %c0_1 = arith.constant 0 : index
    %0 = vector.load %arg2[%c0, %c0_0, %c0_1] : memref<1x8x32xf32, #tpu.memory_space<vmem>>, vector<1x8x32xf32>
    %1 = vector.shape_cast %0 : vector<1x8x32xf32> to vector<8x32xf32>
    %c0_2 = arith.constant 0 : index
    %c0_3 = arith.constant 0 : index
    %c0_4 = arith.constant 0 : index
    %2 = vector.load %arg3[%c0_2, %c0_3, %c0_4] : memref<1x16x32xf32, #tpu.memory_space<vmem>>, vector<1x16x32xf32>
    %3 = vector.shape_cast %2 : vector<1x16x32xf32> to vector<16x32xf32>
    %cst = arith.constant dense<0.000000e+00> : vector<8x16xf32>
    %4 = tpu.matmul %1, %3, %cst {dimension_numbers = #tpu.dot_dimension_numbers<[1], [1], [0], [0], [0, 0, 1, 0], [], []>} : vector<8x32xf32>, vector<16x32xf32>, vector<8x16xf32> -> vector<8x16xf32>
    %cst_5 = arith.constant dense<0xFF800000> : vector<8xf32>
    %5 = vector.multi_reduction <maximumf>, %4, %cst_5 [1] : vector<8x16xf32> to vector<8xf32>
    %6 = vector.shape_cast %5 : vector<8xf32> to vector<8x1xf32>
    %7 = vector.broadcast %6 : vector<8x1xf32> to vector<8x16xf32>
    %8 = arith.subf %4, %7 : vector<8x16xf32>
    %9 = math.exp %8 : vector<8x16xf32>
    %cst_6 = arith.constant dense<0.000000e+00> : vector<8xf32>
    %10 = vector.multi_reduction <add>, %9, %cst_6 [1] : vector<8x16xf32> to vector<8xf32>
    %11 = vector.shape_cast %10 : vector<8xf32> to vector<8x1xf32>
    %cst_7 = arith.constant 1.000000e+00 : f32
    %12 = vector.broadcast %cst_7 : f32 to vector<8x1xf32>
    %13 = arith.divf %12, %11 : vector<8x1xf32>
    %cst_8 = arith.constant dense<0.000000e+00> : vector<8x32xf32>
    %14 = tpu.matmul %9, %3, %cst_8 {dimension_numbers = #tpu.dot_dimension_numbers<[1], [0], [0], [1], [0, 0, 1, 1], [], []>} : vector<8x16xf32>, vector<16x32xf32>, vector<8x32xf32> -> vector<8x32xf32>
    %15 = vector.broadcast %13 : vector<8x1xf32> to vector<8x32xf32>
    %16 = arith.mulf %14, %15 : vector<8x32xf32>
    %17 = vector.broadcast %13 : vector<8x1xf32> to vector<8x16xf32>
    %18 = arith.mulf %9, %17 : vector<8x16xf32>
    %c0_9 = arith.constant 0 : index
    %c0_10 = arith.constant 0 : index
    %c0_11 = arith.constant 0 : index
    %19 = vector.load %arg4[%c0_9, %c0_10, %c0_11] : memref<1x8x32xf32, #tpu.memory_space<vmem>>, vector<1x8x32xf32>
    %20 = vector.shape_cast %19 : vector<1x8x32xf32> to vector<8x32xf32>
    %21 = vector.shape_cast %16 : vector<8x32xf32> to vector<1x8x32xf32>
    tpu.vector_store %arg4[%c0_9, %c0_10, %c0_11], %21 {strides = array<i32>} : memref<1x8x32xf32, #tpu.memory_space<vmem>>, vector<1x8x32xf32>,
    %c0_12 = arith.constant 0 : index
    %c0_13 = arith.constant 0 : index
    %c0_14 = arith.constant 0 : index
    %22 = vector.load %arg5[%c0_12, %c0_13, %c0_14] : memref<1x8x16xf32, #tpu.memory_space<vmem>>, vector<1x8x16xf32>
    %23 = vector.shape_cast %22 : vector<1x8x16xf32> to vector<8x16xf32>
    %24 = vector.shape_cast %18 : vector<8x16xf32> to vector<1x8x16xf32>
    tpu.vector_store %arg5[%c0_12, %c0_13, %c0_14], %24 {strides = array<i32>} : memref<1x8x16xf32, #tpu.memory_space<vmem>>, vector<1x8x16xf32>,
    return
  }
  func.func @transform_0(%arg0: i32, %arg1: i32) -> (i32, i32, i32) {
    %c0_i32 = arith.constant 0 : i32
    %c0_i32_0 = arith.constant 0 : i32
    return %arg0, %arg1, %c0_i32 : i32, i32, i32
  }
  func.func @transform_1(%arg0: i32, %arg1: i32) -> (i32, i32, i32) {
    %c0_i32 = arith.constant 0 : i32
    %c0_i32_0 = arith.constant 0 : i32
    %c0_i32_1 = arith.constant 0 : i32
    return %arg0, %c0_i32, %c0_i32_0 : i32, i32, i32
  }
  func.func @transform_2(%arg0: i32, %arg1: i32) -> (i32, i32, i32) {
    %c0_i32 = arith.constant 0 : i32
    %c0_i32_0 = arith.constant 0 : i32
    return %arg0, %arg1, %c0_i32 : i32, i32, i32
  }
  func.func @transform_3(%arg0: i32, %arg1: i32) -> (i32, i32, i32) {
    %c0_i32 = arith.constant 0 : i32
    %c0_i32_0 = arith.constant 0 : i32
    return %arg0, %arg1, %c0_i32 : i32, i32, i32
  }
}

</mosaic_0001>

<bundles_post_ra>
// kernel: tpu_custom_call.1
= control target key start
LH: loop header
LB: loop body
LE: loop exit
PB: predicated region body
PF: predicated region fallthrough
CT: control target
= control target key end

     0   :  { %9 = vsyncpa [#allocation3], 0  ;;  %s1209_s0 = inlined_call_operand.hbm [shape: f32[2,8,32], index: 0, kind: input, shape index: {}]   ;;  %s1210_s1 = inlined_call_operand.hbm [shape: f32[2,16,32], index: 1, kind: input, shape index: {}]   ;;  %s1211_s2 = inlined_call_operand.hbm [shape: f32[2,8,32], index: 2, kind: output, shape index: {0}]   ;;  %s1212_s3 = inlined_call_operand.hbm [shape: f32[2,8,16], index: 3, kind: output, shape index: {1}]  }
   0x1   :  { %11 = vsyncpa [#allocation3 + $0x1], 0 }
   0x2   :  { %12 = vsyncpa [#allocation6], 0 }
   0x3   :  { %14 = vsyncpa [#allocation6 + $0x1], 0 }
   0x4   :  { %15 = vsyncpa [#allocation4], 0 }
   0x5   :  { %17 = vsyncpa [#allocation4 + $0x1], 0 }
   0x6   :  { %18 = vsyncpa [#allocation9], 0 }
   0x7   :  { %20 = vsyncpa [#allocation9 + $0x1], 0  ;;  %s940_s12 = smov 0   ;;  %s942_s13 = smov 0  }
   0x8   :  { %s944_s14 = smov 0   ;;  %s946_s15 = smov 0  }
   0x9   :  { %s948_s16 = smov 0   ;;  %s950_s17 = smov 0  }
   0xa LB: > { %s598_s18 = sadd.s32 4294967295, %s909_s17   ;;  %s599_s19 = sadd.s32 4294967294, %s909_s17   ;;  %s909_s17 = sphi %s950_s17, %s26_s17   ;;  %s905_s16 = sphi %s948_s16, %s1231_s16   ;;  %s901_s15 = sphi %s946_s15, %s1230_s15   ;;  %s897_s14 = sphi %s944_s14, %s1229_s14   ;;  %s893_s13 = sphi %s942_s13, %s1228_s13   ;;  %s889_s12 = sphi %s940_s12, %s1227_s12  }
   0xb   : > { %s38_s20 = sadd.s32 1, %s905_s16  ;;  %s47_s21 = sadd.s32 1, %s897_s14 }
   0xc   : > { %p40_p0 = scmp.ge.s32.totalorder %s38_s20, 2  ;;  %p54_p1 = scmp.ne.s32.totalorder %s897_s14, %s893_s13 }
   0xd   : > { %p55_p2 = scmp.eq.s32.totalorder %s909_s17, 0  ;;  %p60_p3 = scmp.ne.s32.totalorder %s893_s13, %s889_s12 }
   0xe   : > { %s1233_s20 = smov (%p40_p0, %s38_s20), 0  ;;  %p61_p5 = scmp.eq.s32.totalorder %s598_s18, 0 }
   0xf   : > { %p981_p4 = por %p55_p2, %p54_p1  ;;  %s42_s23 = ssub.s32 %s905_s16, %s1233_s20 }
  0x10   : > { %p112_p6 = scmp.eq.s32.totalorder %s598_s18, 1  ;;  %p45_p7 = scmp.eq.s32.totalorder %s42_s23, 0 }
  0x11   : > { %p987_p8 = por %p61_p5, %p60_p3  ;;  %p118_p10 = scmp.eq.s32.totalorder %s599_s19, 1 }
  0x12   : > { %p991_p9 = por %p112_p6, %p54_p1  ;;  %p672_p13 = scmp.lt.s32.totalorder %s909_s17, 2 }
  0x13   : > { %s1216_s24 = scalar_select %p987_p8, 1, 0 }
  0x14   : > { %s1217_s25 = scalar_select %p991_p9, 1, 0 }
  0x15   : > { %s996_s26 = scalar_select %p45_p7, %s897_s14, %s47_s21  }
  0x16   : > { %p998_p11 = por %p118_p10, %p60_p3  ;;  %s1005_s28 = sand.u32 1, %s897_s14  }
  0x17   : > { %s602_s29 = sshll.u32 %s1005_s28, 3  ;;  %s603_s30 = sshll.u32 %s905_s16, 7 }
  0x18   : > { %s1218_s27 = scalar_select %p998_p11, 1, 0 }
  0x19   : > { %s1012_s6 = scalar_lea.hbm %s1209_s0, %s603_s30  ;;  %s170_s7 = scalar_lea.vmem [#allocation2], %s602_s29 }
  0x1a   : > { %s178_s8 = sshll.u32 %s170_s7, 4  ;;  %p1018_p0 = pnand %p672_p13, %p981_p4  ;;  %s1014_s8 = int_to_ptr.vmem [resolvable:$true] %s178_s8 }
  0x1b   : > { %s167_s10 = scalar_lea.sflag [#allocation3], %s1005_s28  ;;  %s731_s11 = scalar_lea.hbm %s1012_s6, 128 }
  0x1c   : > { %p732_p3 = scmp.ne.s32.totalorder %s1012_s6, %s731_s11  ;;  %p733_p5 = pneg %p1018_p0 }
  0x1d   : > { %s736_s21 = scalar_lea.hbm %s1209_s0, 256  ;;  %p737_p4 = scmp.lt.u32.totalorder %s1012_s6, %s1209_s0 }
  0x1e   : > { %p734_p6 = pnand %p733_p5, %p732_p3  ;;  %p738_p10 = scmp.lt.u32.totalorder %s736_s21, %s731_s11 }
  0x1f   : > { %p740_p12 = scmp.lt.u32.totalorder %s731_s11, %s1012_s6 }
  0x20   : > { %p735_p7 = pneg %p734_p6  ;;  %p739_p13 = por %p738_p10, %p737_p4 }
  0x22   : > { %p741_p1 = por %p740_p12, %p739_p13 }
  0x24   : > { %p742_p2 = pnand %p741_p1, %p735_p7 }
  0x26   : > { %745 = shalt.err (!%p742_p2)
}
  0x27   : > { %s746_s29 = scalar_lea.vmem %s1014_s8, 128  ;;  %s911_s30 = smov [#allocation2]  }
  0x28   : > { %p747_p3 = scmp.ne.s32.totalorder %s1014_s8, %s746_s29  ;;  %s751_s4 = sshll.u32 %s911_s30, 4  ;;  %s752_s4 = int_to_ptr.vmem [resolvable:$false] %s751_s4 }
  0x29   : > { %s753_s5 = scalar_lea.vmem %s752_s4, 256  ;;  %p754_p9 = scmp.lt.s32.totalorder %s1014_s8, %s752_s4 }
  0x2a   : > { %p749_p6 = pnand %p747_p3, %p733_p5  ;;  %p755_p4 = scmp.lt.s32.totalorder %s753_s5, %s746_s29 }
  0x2c   : > { %p750_p11 = pneg %p749_p6  ;;  %p756_p10 = por %p755_p4, %p754_p9 }
  0x2e   : > { %p757_p12 = pnand %p756_p10, %p750_p11 }
  0x30   : > { %760 = shalt.err (!%p757_p12)
}
  0x31   : > { %661 = dma.hbm_to_vmem [thread:$0]  (!%p1018_p0), %s1012_s6, 128, %s1014_s8, %s167_s10  }
  0x32   : > { %p1220_p1 = scmp.lt.s32.totalorder %s909_s17, 3  ;;  %p1221_p2 = scmp.ge.s32.totalorder %s909_s17, 1 }
  0x33   : > { %s604_s11 = sshll.u32 %s1005_s28, 4  ;;  %s622_s18 = sshll.u32 %s905_s16, 8 }
  0x34   : > { %p1054_p7 = pnand %p1221_p2, %p1220_p1  ;;  %s1063_s22 = scalar_lea.hbm %s1210_s1, %s622_s18 }
  0x35   : > { %s189_s23 = scalar_lea.vmem [#allocation5], %s604_s11  ;;  %s186_s6 = scalar_lea.sflag [#allocation6], %s1005_s28 }
  0x36   : > { %s196_s29 = sshll.u32 %s189_s23, 4  ;;  %s761_s8 = scalar_lea.hbm %s1063_s22, 256  ;;  %s1065_s29 = int_to_ptr.vmem [resolvable:$true] %s196_s29 }
  0x37   : > { %p762_p9 = scmp.ne.s32.totalorder %s1063_s22, %s761_s8  ;;  %s766_s4 = scalar_lea.hbm %s1210_s1, 512 }
  0x38   : > { %p767_p3 = scmp.lt.u32.totalorder %s1063_s22, %s1210_s1  ;;  %p768_p6 = scmp.lt.u32.totalorder %s766_s4, %s761_s8 }
  0x39   : > { %p764_p11 = pnand %p762_p9, %p733_p5  ;;  %p770_p10 = scmp.lt.u32.totalorder %s761_s8, %s1063_s22 }
  0x3a   : > { %p769_p4 = por %p768_p6, %p767_p3 }
  0x3b   : > { %p765_p13 = pneg %p764_p11 }
  0x3c   : > { %p771_p12 = por %p770_p10, %p769_p4 }
  0x3e   : > { %p772_p1 = pnand %p771_p12, %p765_p13 }
  0x40   : > { %775 = shalt.err (!%p772_p1)
}
  0x41   : > { %s776_s11 = scalar_lea.vmem %s1065_s29, 256  ;;  %s912_s19 = smov [#allocation5]  }
  0x42   : > { %p777_p2 = scmp.ne.s32.totalorder %s1065_s29, %s776_s11  ;;  %s781_s21 = sshll.u32 %s912_s19, 4  ;;  %s782_s21 = int_to_ptr.vmem [resolvable:$false] %s781_s21 }
  0x43   : > { %s783_s23 = scalar_lea.vmem %s782_s21, 512  ;;  %p784_p8 = scmp.lt.s32.totalorder %s1065_s29, %s782_s21 }
  0x44   : > { %p779_p9 = pnand %p777_p2, %p733_p5  ;;  %p785_p3 = scmp.lt.s32.totalorder %s783_s23, %s776_s11 }
  0x46   : > { %p780_p11 = pneg %p779_p9  ;;  %p786_p6 = por %p785_p3, %p784_p8 }
  0x48   : > { %p787_p4 = pnand %p786_p6, %p780_p11 }
  0x4a   : > { %790 = shalt.err (!%p787_p4)
}
  0x4b   : > { %s913_s8 = smov 128   ;;  %s914_s10 = smov 8  }
  0x4c   : > { %664 = dma.hbm_to_vmem [thread:$0]  (!%p1018_p0), %s1063_s22, 256, %s1065_s29, %s186_s6, %s913_s8, %s913_s8, %s914_s10  }
  0x4d   : > { %208 = sbr.rel (%p1054_p7) target bundleno = 697 (0x2b9), region = 28  ;;  %s1096_s30 = sand.u32 (!%p1054_p7), 1, %s893_s13  }
  0x4e   : > { %s1099_s4 = sshll.u32 (!%p1054_p7), %s1096_s30, 3  ;;  %s211_s5 = scalar_lea.sflag (!%p1054_p7), [#allocation3], %s1096_s30 }
  0x4f   : > { %s214_s18 = scalar_lea.vmem (!%p1054_p7), [#allocation2], %s1099_s4  ;;  %p1223_p8 = scmp.ne.s32.totalorder (!%p1054_p7), %s1216_s24, 0 }
  0x54   : > { %872 = dma.done.wait (%p1223_p8), %s211_s5, 128  }
  0x55   : > { %874 = vsyncadd (%p1223_p8), %s211_s5, 4294967168  ;;  %s609_s28 = sshll.u32 %s1096_s30, 4  ;;  %s220_s9 = scalar_lea.sflag [#allocation6], %s1096_s30 }
  0x56   : > { %s223_s7 = scalar_lea.vmem [#allocation5], %s609_s28 }
  0x57   : > { %876 = dma.done.wait (%p1223_p8), %s220_s9, 256  }
  0x58   : > { %878 = vsyncadd (%p1223_p8), %s220_s9, 4294967040  ;;  %v915_v0 = vmov 0.0|0.0   ;;  %vm916_vm0 = vmmov 0   ;;  %v917_v1 = vmov 0.0   ;;  %vm259_vm1 = vcmask 261120   ;;  %v257_v2 = vld [vmem:[%s223_s7] sm:$0xff] }
  0x59   : > { %643 = vmatprep.subr.bf16.mxu0 %v915_v0  ;;  %633 = vmatprep.mubr.msk.f32.mxu0 %vm916_vm0, %v917_v1  ;;  %v258_v3 = vld [vmem:[%s223_s7 + $0x8] sm:$0xff]  ;;  %vm645_vm2 = vmpackc.low %vm259_vm1, %vm259_vm1  ;;  %vm339_vm3 = vcmask 130048   ;;  %s618_s24 = sshll.u32 %s901_s15, 7  ;;  %s255_s22 = scalar_lea.vmem [#allocation8], %s1099_s4 }
  0x5a   : > { %647 = vmatprep.subr.bf16.mxu1 %v915_v0  ;;  %640 = vmatprep.mubr.msk.f32.mxu1 %vm916_vm0, %v917_v1  ;;  %v644_v4 = vpack.c.bf16 %v258_v3, %v257_v2  ;;  %v256_v5 = vld [vmem:[%s214_s18] sm:$0xff]  ;;  %s462_s29 = sshll.u32 %s255_s22, 4  ;;  %s1126_s19 = scalar_lea.hbm %s1212_s3, %s618_s24  ;;  %s1128_s29 = int_to_ptr.vmem [resolvable:$true] %s462_s29 }
  0x5b   : > { %s434_s21 = scalar_lea.sflag [#allocation9], %s1096_s30  ;;  %s791_s23 = scalar_lea.vmem %s1128_s29, 128 }
  0x5c   : > { %646 = vmatpush3.bf16.xpose.msk.msra.mxu0 %vm645_vm2, %v644_v4  ;;  %649 = vmatpush3.bf16.msra.mxu1 %v644_v4  ;;  %p792_p0 = scmp.ne.s32.totalorder %s1128_s29, %s791_s23  ;;  %p1224_p5 = scmp.ne.s32.totalorder %s1217_s25, 0 }
  0x5d   : > { %s918_s8 = smov [#allocation8]  }
  0x5e   : > { %p793_p7 = pnand %p792_p0, %p1224_p5  ;;  %s795_s10 = sshll.u32 %s918_s8, 4  ;;  %s796_s10 = int_to_ptr.vmem [resolvable:$false] %s795_s10 }
  0x5f   : > { %s797_s5 = scalar_lea.vmem %s796_s10, 256  ;;  %p798_p10 = scmp.lt.s32.totalorder %s1128_s29, %s796_s10 }
  0x60   : > { %p794_p13 = pneg %p793_p7  ;;  %p799_p12 = scmp.lt.s32.totalorder %s797_s5, %s791_s23 }
  0x62   : > { %p800_p1 = por %p799_p12, %p798_p10 }
  0x63   : > { %634 = vmatmul.mubr.msk.f32.vlgmr.msra.gmra.mrb[0].mxu0 %vm259_vm1, %v256_v5 }
  0x64   : > { %p801_p2 = pnand %p800_p1, %p794_p13 }
 0x136   : > { %v335_v6 = vpop.f32.mrb[0].mxu0 }
 0x137   : > { %v635_v7 = vpop.f32.mrb[1].mxu0  ;;  %v340_v8 = vsel %vm339_vm3, %v335_v6, -inf }
 0x138   : > { %341 = vmax.xlane.f32.xlu0 %v340_v8 }
 0x1c5   : > { %v342_v9 = vpop.xlane.xlu0 %341 }
 0x1c6   : > { %v343_v10 = vsub.f32 %v335_v6, %v342_v9 }
 0x1c8   : > { %v344_v11 = vmul.f32 1.442695, %v343_v10 }
 0x1ca   : > { %727 = vpow2.f32 %v344_v11 }
 0x1d4   : > { %v728_v12 = vpop.eup %727 }
 0x1d5   : > { %641 = vmatmul.mubr.msk.f32.vlgmr.msra.gmra.mrb[0].mxu1 %vm339_vm3, %v728_v12  ;;  %v346_v13 = vsel %vm339_vm3, %v728_v12, 0.0 }
 0x1d6   : > { %347 = vadd.xlane.f32.xlu0 %v346_v13 }
 0x263   : > { %v348_v14 = vpop.xlane.xlu0 %347 }
 0x264   : > { %729 = vrcp.f32 %v348_v14 }
 0x26e   : > { %v730_v15 = vpop.eup %729 }
 0x26f   : > { %v425_v16 = vmul.f32 %v730_v15, %v728_v12 }
 0x271   : > { %427 = vst.msk [vmem:[%s255_s22] sm:$0xff] %vm339_vm3, %v425_v16 }
 0x272   : > { %804 = shalt.err (!%p801_p2)
}
 0x273   : > { %s805_s18 = scalar_lea.hbm %s1126_s19, 128  ;;  %s809_s7 = scalar_lea.hbm %s1212_s3, 256 }
 0x274   : > { %p806_p9 = scmp.ne.s32.totalorder %s1126_s19, %s805_s18  ;;  %p810_p6 = scmp.lt.u32.totalorder %s1126_s19, %s1212_s3 }
 0x275   : > { %p811_p4 = scmp.lt.u32.totalorder %s809_s7, %s805_s18  ;;  %p813_p0 = scmp.lt.u32.totalorder %s805_s18, %s1126_s19 }
 0x276   : > { %p807_p11 = pnand %p806_p9, %p1224_p5 }
 0x277   : > { %p812_p8 = por %p811_p4, %p810_p6 }
 0x278   : > { %p808_p3 = pneg %p807_p11 }
 0x279   : > { %p814_p7 = por %p813_p0, %p812_p8 }
 0x27b   : > { %p815_p13 = pnand %p814_p7, %p808_p3 }
 0x27d   : > { %818 = shalt.err (!%p815_p13)
}
 0x27e   : > { %655 = dma.vmem_to_hbm [thread:$0]  (%p1224_p5), %s1128_s29, 128, %s1126_s19, %s434_s21  }
 0x27f   : > { %s248_s11 = scalar_lea.vmem [#allocation7], %s1099_s4  ;;  %s1159_s5 = scalar_lea.hbm %s1211_s2, %s618_s24 }
 0x280   : > { %s448_s23 = sshll.u32 %s248_s11, 4  ;;  %s429_s18 = scalar_lea.sflag [#allocation4], %s1096_s30  ;;  %s1161_s23 = int_to_ptr.vmem [resolvable:$true] %s448_s23 }
 0x281   : > { %s819_s29 = scalar_lea.vmem %s1161_s23, 128  ;;  %s919_s4 = smov [#allocation7]  }
 0x282   : > { %p820_p10 = scmp.ne.s32.totalorder %s1161_s23, %s819_s29  ;;  %s823_s15 = sshll.u32 %s919_s4, 4  ;;  %s824_s15 = int_to_ptr.vmem [resolvable:$false] %s823_s15 }
 0x283   : > { %s825_s19 = scalar_lea.vmem %s824_s15, 256  ;;  %p826_p2 = scmp.lt.s32.totalorder %s1161_s23, %s824_s15 }
 0x284   : > { %p821_p12 = pnand %p820_p10, %p1224_p5  ;;  %p827_p9 = scmp.lt.s32.totalorder %s825_s19, %s819_s29 }
 0x286   : > { %p822_p1 = pneg %p821_p12  ;;  %p828_p11 = por %p827_p9, %p826_p2 }
 0x288   : > { %p829_p3 = pnand %p828_p11, %p822_p1 }
 0x2a8   : > { %v420_v17 = vpop.f32.mrb[0].mxu1 }
 0x2a9   : > { %v424_v18 = vmul.f32 %v730_v15, %v420_v17  ;;  %v642_v19 = vpop.f32.mrb[1].mxu1 }
 0x2ab   : > { %426 = vst.msk [vmem:[%s248_s11] sm:$0xff] %vm259_vm1, %v424_v18 }
 0x2ac   : > { %832 = shalt.err (!%p829_p3)
}
 0x2ad   : > { %s833_s30 = scalar_lea.hbm %s1159_s5, 128  ;;  %s837_s28 = scalar_lea.hbm %s1211_s2, 256 }
 0x2ae   : > { %p834_p6 = scmp.ne.s32.totalorder %s1159_s5, %s833_s30  ;;  %p838_p0 = scmp.lt.u32.totalorder %s1159_s5, %s1211_s2 }
 0x2af   : > { %p839_p7 = scmp.lt.u32.totalorder %s837_s28, %s833_s30  ;;  %p841_p10 = scmp.lt.u32.totalorder %s833_s30, %s1159_s5 }
 0x2b0   : > { %p835_p4 = pnand %p834_p6, %p1224_p5 }
 0x2b1   : > { %p840_p13 = por %p839_p7, %p838_p0 }
 0x2b2   : > { %p836_p8 = pneg %p835_p4 }
 0x2b3   : > { %p842_p12 = por %p841_p10, %p840_p13 }
 0x2b5   : > { %p843_p1 = pnand %p842_p12, %p836_p8 }
 0x2b7   : > { %846 = shalt.err (!%p843_p1)
}
 0x2b8   : > { %654 = dma.vmem_to_hbm [thread:$0]  (%p1224_p5), %s1161_s23, 128, %s1159_s5, %s429_s18  }
 0x2b9 PF: > { %s474_s22 = sand.u32 1, %s889_s12   ;;  %p1225_p2 = scmp.ne.s32.totalorder %s1218_s27, 0 }
 0x2ba   : > { %p1226_p9 = scmp.ge.s32.totalorder %s909_s17, 2  ;;  %s475_s6 = scalar_lea.sflag [#allocation4], %s474_s22 }
 0x2bc   : > { %p666_p11 = pnand %p1226_p9, %p1225_p2 }
 0x2be   : > { %880 = dma.done.wait (!%p666_p11), %s475_s6, 128  }
 0x2bf   : > { %882 = vsyncadd (!%p666_p11), %s475_s6, 4294967168  ;;  %s484_s11 = scalar_lea.sflag [#allocation9], %s474_s22 }
 0x2c0   : > { %884 = dma.done.wait (!%p666_p11), %s484_s11, 128  }
 0x2c1   : > { %886 = vsyncadd (!%p666_p11), %s484_s11, 4294967168  ;;  %s26_s17 = sadd.s32 1, %s909_s17   ;;  %s1227_s12 = smov %s893_s13 }
 0x2c2   : > { %p23_p3 = scmp.ge.s32.totalorder %s26_s17, 4   ;;  %s1228_s13 = smov %s897_s14 }
 0x2c3   : > { %s1229_s14 = smov %s996_s26  ;;  %s1230_s15 = smov %s905_s16 }
 0x2c4   : > { %s1231_s16 = smov %s1233_s20  ;;  %25 = sbr.rel (!%p23_p3) target bundleno = 10 (0xa), region = 103 }
 0x2cb   :  { %489 = vsyncpa [#allocation3], 1 }
 0x2cc   :  { %491 = vsyncpa [#allocation3 + $0x1], 1 }
 0x2cd   :  { %492 = vsyncpa [#allocation6], 1 }
 0x2ce   :  { %494 = vsyncpa [#allocation6 + $0x1], 1 }
 0x2cf   :  { %495 = vsyncpa [#allocation4], 1 }
 0x2d0   :  { %497 = vsyncpa [#allocation4 + $0x1], 1 }
 0x2d1   :  { %498 = vsyncpa [#allocation9], 1 }
 0x2d2   :  { %500 = vsyncpa [#allocation9 + $0x1], 1 }

</bundles_post_ra>
